<compile_context>
chip_gen: v7x
topology: tpu7x:2x2x1
jax: 0.10.0
libtpu: 0.0.40
codegen_flags: <defaults>
</compile_context>

<pallas_src>
import jax
import jax.numpy as jnp
from jax.experimental import pallas as pl
from jax.experimental.pallas import tpu as pltpu

LANE = 128


def linear11_kernel(x_ref, w_ref, b_ref, o_ref):
    # x_ref / o_ref: one VMEM tile of the (row, lane)-dense view of x.
    # w_ref / b_ref: 1-element SMEM scalars.
    w = w_ref[0]
    b = b_ref[0]
    o_ref[...] = x_ref[...] * w + b          # single VPU multiply-add


def linear_pallas(x, weight, bias, *, block_rows=512):
    """y = x @ weight.T + bias for torch.nn.Linear(1, 1).

    x:      [N, 1]
    weight: [1, 1]   (PyTorch convention [out_features, in_features])
    bias:   [1]
    returns [N, 1]
    """
    n, in_f = x.shape
    out_f, w_in = weight.shape
    assert in_f == 1 and out_f == 1 and w_in == 1, "specialized for Linear(1, 1)"

    # Scalars live in SMEM; compute in x.dtype (f32 for this module).
    w1 = weight.reshape(1).astype(x.dtype)
    b1 = bias.reshape(1).astype(x.dtype)

    smem_spec = pl.BlockSpec(memory_space=pltpu.MemorySpace.SMEM)
    cparams = pltpu.CompilerParams(dimension_semantics=("parallel",))

    if n % LANE == 0:
        # Sublane- AND lane-dense slab: [rows, 128] (metadata-only reshape).
        rows = n // LANE
        blk_r = block_rows if rows >= block_rows else rows   # 512x128 f32 = 256 KiB/buf
        grid = (pl.cdiv(rows, blk_r),)
        x2 = x.reshape(rows, LANE)
        y2 = pl.pallas_call(
            linear11_kernel,
            out_shape=jax.ShapeDtypeStruct((rows, LANE), x.dtype),
            grid=grid,
            in_specs=[
                pl.BlockSpec((blk_r, LANE), lambda i: (i, 0)),
                smem_spec,
                smem_spec,
            ],
            out_specs=pl.BlockSpec((blk_r, LANE), lambda i: (i, 0)),
            compiler_params=cparams,
        )(x2, w1, b1)
        return y2.reshape(n, 1)

    # Ragged N: lane-dense [1, N] view (metadata-only); Pallas zero-pads the
    # partial last block on load and masks the partial output store, so no
    # host-side pad or unpad-slice is needed.
    x2 = x.reshape(1, n)
    blk_n = min(block_rows * LANE, pl.cdiv(n, LANE) * LANE)
    grid = (pl.cdiv(n, blk_n),)
    y2 = pl.pallas_call(
        linear11_kernel,
        out_shape=jax.ShapeDtypeStruct((1, n), x.dtype),
        grid=grid,
        in_specs=[
            pl.BlockSpec((1, blk_n), lambda i: (0, i)),
            smem_spec,
            smem_spec,
        ],
        out_specs=pl.BlockSpec((1, blk_n), lambda i: (0, i)),
        compiler_params=cparams,
    )(x2, w1, b1)
    return y2.reshape(n, 1)

    # TODO(synk): for a tiny fixed N like 10, a plain fused XLA x*w+b is
    # cheaper than any custom call; the Pallas path is kept per the exercise.


if __name__ == "__main__":
    # Deterministic parameter init (Linear(1, 1): weight [1, 1], bias [1]).
    key = jax.random.PRNGKey(0)
    k_w, k_b = jax.random.split(key)
    weight = jax.random.uniform(k_w, (1, 1), jnp.float32, -1.0, 1.0)
    bias = jax.random.uniform(k_b, (1,), jnp.float32, -1.0, 1.0)

    # Input mirroring the module's script: x = [[0], [1], ..., [9]]
    x = jnp.arange(10, dtype=jnp.float32).reshape(10, 1)

    # jit the whole wrapper so the metadata reshapes fuse around the call.
    linear = jax.jit(linear_pallas)
    y = linear(x, weight, bias)
    jax.block_until_ready(y)

    # Reference check in plain JAX.
    y_ref = x @ weight.T + bias
    assert y.shape == y_ref.shape, (y.shape, y_ref.shape)
    assert jnp.allclose(y, y_ref, atol=1e-5), (y, y_ref)

    print("KERNEL_OK")
</pallas_src>

<mosaic_0001>
module attributes {stable_mosaic.version = 11 : i64} {
  func.func @linear11_kernel(%arg0: i32, %arg1: memref<1x128xf32, #tpu.memory_space<vmem>>, %arg2: memref<1xf32, #tpu.memory_space<smem>>, %arg3: memref<1xf32, #tpu.memory_space<smem>>, %arg4: memref<1x128xf32, #tpu.memory_space<vmem>>) attributes {dimension_semantics = [#tpu.dimension_semantics<parallel>], iteration_bounds = array<i64: 1>, scalar_prefetch = 0 : i64, scratch_operands = 0 : i64, tpu.core_type = #tpu.core_type<tc>, window_params = [{transform_indices = @transform_0, window_bounds = array<i64: 1, 128>}, {transform_indices = @transform_1, window_bounds = array<i64: 1>}, {transform_indices = @transform_2, window_bounds = array<i64: 1>}, {transform_indices = @transform_3, window_bounds = array<i64: 1, 128>}]} {
    %c0 = arith.constant 0 : index
    %0 = memref.load %arg2[%c0] : memref<1xf32, #tpu.memory_space<smem>>
    %c0_0 = arith.constant 0 : index
    %1 = memref.load %arg3[%c0_0] : memref<1xf32, #tpu.memory_space<smem>>
    %c0_1 = arith.constant 0 : index
    %c0_2 = arith.constant 0 : index
    %2 = vector.load %arg1[%c0_1, %c0_2] : memref<1x128xf32, #tpu.memory_space<vmem>>, vector<1x128xf32>
    %3 = vector.broadcast %0 : f32 to vector<1x128xf32>
    %4 = arith.mulf %2, %3 : vector<1x128xf32>
    %5 = vector.broadcast %1 : f32 to vector<1x128xf32>
    %6 = arith.addf %4, %5 : vector<1x128xf32>
    %c0_3 = arith.constant 0 : index
    %c0_4 = arith.constant 0 : index
    %7 = vector.load %arg4[%c0_3, %c0_4] : memref<1x128xf32, #tpu.memory_space<vmem>>, vector<1x128xf32>
    tpu.vector_store %arg4[%c0_3, %c0_4], %6 {strides = array<i32>} : memref<1x128xf32, #tpu.memory_space<vmem>>, vector<1x128xf32>,
    return
  }
  func.func @transform_0(%arg0: i32) -> (i32, i32) {
    %c0_i32 = arith.constant 0 : i32
    %c0_i32_0 = arith.constant 0 : i32
    return %c0_i32, %arg0 : i32, i32
  }
  func.func @transform_1(%arg0: i32) -> i32 {
    %c0_i32 = arith.constant 0 : i32
    %c0_i32_0 = arith.constant 0 : i32
    return %c0_i32 : i32
  }
  func.func @transform_2(%arg0: i32) -> i32 {
    %c0_i32 = arith.constant 0 : i32
    %c0_i32_0 = arith.constant 0 : i32
    return %c0_i32 : i32
  }
  func.func @transform_3(%arg0: i32) -> (i32, i32) {
    %c0_i32 = arith.constant 0 : i32
    %c0_i32_0 = arith.constant 0 : i32
    return %c0_i32, %arg0 : i32, i32
  }
}

</mosaic_0001>

<bundles_post_ra>
// kernel: linear_pallas.1
= control target key start
LH: loop header
LB: loop body
LE: loop exit
PB: predicated region body
PF: predicated region fallthrough
CT: control target
= control target key end

     0   :  { %s106_s0 = inlined_call_operand.vmem [shape: f32[1,10], index: 0, kind: input, shape index: {}]   ;;  %s107_s1 = inlined_call_operand.<no memory space> [shape: f32[1], index: 1, kind: input, shape index: {}]   ;;  %s108_s2 = inlined_call_operand.<no memory space> [shape: f32[1], index: 2, kind: input, shape index: {}]   ;;  %s109_s3 = inlined_call_operand.hbm [shape: f32[1,10], index: 3, kind: output, shape index: {}]  }
   0x1   :  { %v19_v0 = vld [vmem:[%s106_s0] sm:$0x1]  ;;  %v20_v1 = vstv %s107_s1  ;;  %v22_v2 = vstv %s108_s2 }
   0x2   :  { %10 = vsyncpa [#allocation5], 0  ;;  %v21_v3 = vmul.f32 %v20_v1, %v19_v0  ;;  %s64_s18 = smov [#allocation4]  }
   0x3   :  { %s31_s19 = sshll.u32 %s64_s18, 4  ;;  %s32_s19 = int_to_ptr.vmem [resolvable:$true] %s31_s19 }
   0x4   :  { %v23_v4 = vadd.f32 %v22_v2, %v21_v3  ;;  %s40_s20 = scalar_lea.vmem %s32_s19, 16  ;;  %s44_s21 = scalar_lea.vmem %s32_s19, 32 }
   0x5   :  { %p41_p0 = scmp.ne.s32.totalorder %s32_s19, %s40_s20  ;;  %p45_p1 = scmp.lt.s32.totalorder %s32_s19, %s32_s19 }
   0x6   :  { %24 = vst [vmem:[#allocation4] sm:$0x1] %v23_v4  ;;  %p46_p2 = scmp.lt.s32.totalorder %s44_s21, %s40_s20 }
   0x8   :  { %p47_p3 = por %p46_p2, %p45_p1 }
   0xa   :  { %p48_p4 = pnand %p47_p3, %p41_p0 }
   0xc   :  { %51 = shalt.err (!%p48_p4)
}
   0xd   :  { %s52_s22 = scalar_lea.hbm %s109_s3, 16 }
   0xe   :  { %p53_p5 = scmp.ne.s32.totalorder %s109_s3, %s52_s22  ;;  %p56_p6 = scmp.lt.u32.totalorder %s52_s22, %s109_s3 }
  0x10   :  { %p58_p7 = pnand %p56_p6, %p53_p5 }
  0x12   :  { %61 = shalt.err (!%p58_p7)
}
  0x13   :  { %34 = dma.vmem_to_hbm [thread:$0]  %s32_s19, 16, %s109_s3, [#allocation5]  }
  0x14   :  { %62 = dma.done.wait [#allocation5], 16  }
  0x15   :  { %63 = vsyncadd [#allocation5], 4294967280 }
  0x16   :  { %38 = vsyncpa [#allocation5], 1 }

</bundles_post_ra>
